<compile_context>
chip_gen: v6e
topology: v6e:2x2x1
jax: 0.10.0
libtpu: 0.0.40
codegen_flags: <defaults>
</compile_context>

<pallas_src>
import functools

import jax
import jax.numpy as jnp
from jax.experimental import pallas as pl
from jax.experimental.pallas import tpu as pltpu

LANES = 128
CHUNK_ROWS = 512                 # in-kernel fold chunk (256 KiB f32 per input)
_SUBLANE = {4: 8, 2: 16, 1: 32}  # min sublane multiple per itemsize


def _round_up(x, m):
    return (x + m - 1) // m * m


def _hw_config():
    """(num TensorCores to split across, base f32 tile rows) from device kind."""
    try:
        kind = jax.devices()[0].device_kind.lower()
    except Exception:
        kind = ""
    ncores = 2 if "v7" in kind else 1          # only v7x has 2 TCs per chip
    tile_rows = 4096 if "v5" in kind else 8192  # v5e scoped-VMEM default is 16 MiB
    return ncores, tile_rows


NCORES, TILE_ROWS_F32 = _hw_config()


def _obs_cost_kernel(state_ref, inp_ref, sumsq_ref, count_ref, *,
                     valid_rows, blocks_per_core, chunk_rows, n_chunks):
    c = pl.program_id(0)   # core / partial index
    i = pl.program_id(1)   # reduction step ("arbitrary")

    @pl.when(i == 0)
    def _init():
        sumsq_ref[...] = jnp.zeros_like(sumsq_ref)
        count_ref[...] = jnp.zeros_like(count_ref)

    block_rows = state_ref.shape[0]
    blk = c * blocks_per_core + i            # unclamped logical block index
    row0 = blk * block_rows

    def chunk_partials(k, bounds_check):
        off = k * chunk_rows
        if not isinstance(off, int):
            off = pl.multiple_of(off, chunk_rows)
        x = inp_ref[pl.ds(off, chunk_rows), :].astype(jnp.float32)
        s = state_ref[pl.ds(off, chunk_rows), :].astype(jnp.float32)
        mask = jnp.isfinite(x)
        if bounds_check:  # only the last (padded / clamped) block of a core
            row_ids = (row0 + off) + jax.lax.broadcasted_iota(
                jnp.int32, (chunk_rows, LANES), 0)
            mask = jnp.logical_and(mask, row_ids < valid_rows)
        diff = jnp.where(mask, s - x, 0.0)           # single select; kills NaN/Inf
        sq3 = (diff * diff).reshape(chunk_rows // 8, 8, LANES)
        m3 = mask.astype(jnp.float32).reshape(chunk_rows // 8, 8, LANES)
        return (jnp.sum(sq3, axis=0, keepdims=True),
                jnp.sum(m3, axis=0, keepdims=True))

    def accumulate(bounds_check):
        if n_chunks == 1:
            ss, cc = chunk_partials(0, bounds_check)
        else:
            def body(k, carry):
                ps, pc = chunk_partials(k, bounds_check)
                return carry[0] + ps, carry[1] + pc
            zero = jnp.zeros((1, 8, LANES), jnp.float32)
            ss, cc = jax.lax.fori_loop(0, n_chunks, body, (zero, zero),
                                       unroll=2)
        sumsq_ref[...] += ss
        count_ref[...] += cc

    full_block = row0 + block_rows <= valid_rows

    @pl.when(full_block)
    def _fast():          # interior block: no iota / bound compare
        accumulate(False)

    @pl.when(jnp.logical_not(full_block))
    def _tail():          # ragged tail / clamped extra grid step
        accumulate(True)


@jax.jit
def base_obs_cost(state, inp, w=1.0):
    """state, inp: same shape (any layout, e.g. NCHW). Returns scalar f32 loss."""
    assert state.shape == inp.shape
    n = state.size
    itemsize = jnp.dtype(inp.dtype).itemsize
    sub = _SUBLANE.get(itemsize, 8)

    s_flat = jnp.ravel(state)
    x_flat = jnp.ravel(inp)

    # Handle the <128-element lane remainder in plain JAX (no full-array pad).
    rem = n % LANES
    tail_sumsq = jnp.float32(0.0)
    tail_count = jnp.float32(0.0)
    if rem:
        # TODO(synk): the main-slab slice below still copies n-rem elements; a
        # fully in-kernel lane-mask tail would avoid that copy for shapes whose
        # numel is not a multiple of 128.
        n_main = n - rem
        ts = s_flat[n_main:].astype(jnp.float32)
        tx = x_flat[n_main:].astype(jnp.float32)
        tmask = jnp.isfinite(tx)
        tail_sumsq = jnp.sum(jnp.where(tmask, (ts - tx) ** 2, 0.0))
        tail_count = jnp.sum(tmask.astype(jnp.float32))
        if n_main == 0:
            return (w * tail_sumsq / tail_count).astype(jnp.float32)
        s_flat = s_flat[:n_main]
        x_flat = x_flat[:n_main]

    rows = s_flat.size // LANES
    s2d = s_flat.reshape(rows, LANES)
    x2d = x_flat.reshape(rows, LANES)

    # Keep block byte size roughly constant across dtypes.
    tile_rows = TILE_ROWS_F32 * max(1, 4 // itemsize)
    block_rows = min(tile_rows, _round_up(rows, sub))
    total_blocks = pl.cdiv(rows, block_rows)
    ncores = NCORES if total_blocks > 1 else 1
    blocks_per_core = pl.cdiv(total_blocks, ncores)

    if block_rows % CHUNK_ROWS == 0:
        chunk_rows = CHUNK_ROWS
    else:
        chunk_rows = block_rows
    n_chunks = block_rows // chunk_rows

    # Clamp the block index so "extra" grid steps (padding for the core split)
    # re-read an in-bounds block; the kernel masks their contribution to zero
    # via the unclamped blk / valid_rows check (both derived from
    # blocks_per_core above).
    def in_map(c, i):
        return (jnp.minimum(c * blocks_per_core + i, total_blocks - 1), 0)

    nbuf = 3 if blocks_per_core >= 3 else 2
    spec_kwargs = {}
    if nbuf > 2 and hasattr(pl, "Buffered"):
        spec_kwargs["pipeline_mode"] = pl.Buffered(nbuf)
    in_spec = pl.BlockSpec((block_rows, LANES), in_map, **spec_kwargs)

    if ncores > 1:
        dims = (getattr(pltpu, "CORE_PARALLEL", pltpu.PARALLEL), pltpu.ARBITRARY)
    else:
        dims = ("arbitrary", "arbitrary")

    kernel = functools.partial(
        _obs_cost_kernel, valid_rows=rows, blocks_per_core=blocks_per_core,
        chunk_rows=chunk_rows, n_chunks=n_chunks)

    sumsq_p, count_p = pl.pallas_call(
        kernel,
        out_shape=(
            jax.ShapeDtypeStruct((ncores, 8, LANES), jnp.float32),
            jax.ShapeDtypeStruct((ncores, 8, LANES), jnp.float32),
        ),
        grid_spec=pltpu.PrefetchScalarGridSpec(
            num_scalar_prefetch=0,
            grid=(ncores, blocks_per_core),
            in_specs=[in_spec, in_spec],
            out_specs=(
                pl.BlockSpec((1, 8, LANES), lambda c, i: (c, 0, 0)),
                pl.BlockSpec((1, 8, LANES), lambda c, i: (c, 0, 0)),
            ),
        ),
        compiler_params=pltpu.CompilerParams(dimension_semantics=dims),
        cost_estimate=pl.CostEstimate(
            flops=6 * n, transcendentals=0, bytes_accessed=2 * n * itemsize),
    )(s2d, x2d)

    sumsq = jnp.sum(sumsq_p) + tail_sumsq
    count = jnp.sum(count_p) + tail_count
    # Note: count == 0 (no finite observations) returns NaN, matching torch's
    # mse_loss over an empty selection.  count is exact up to 2^24 per lane.
    return (w * sumsq / count).astype(jnp.float32)


if __name__ == "__main__":
    key = jax.random.PRNGKey(0)
    k1, k2, k3 = jax.random.split(key, 3)

    B, C, H, W = 2, 4, 16, 16  # NCHW, like the PyTorch inputs
    state = jax.random.normal(k1, (B, C, H, W), dtype=jnp.float32)
    inp = jax.random.normal(k2, (B, C, H, W), dtype=jnp.float32)
    # sprinkle some NaNs / Infs into the observation so the mask matters
    nan_mask = jax.random.uniform(k3, (B, C, H, W)) < 0.2
    inp = jnp.where(nan_mask, jnp.nan, inp)
    inp = inp.at[0, 0, 0, 0].set(jnp.inf)

    w = 1.0
    loss = base_obs_cost(state, inp, w)
    jax.block_until_ready(loss)

    # pure-JAX reference check
    msk = jnp.isfinite(inp)
    x_clean = jnp.nan_to_num(inp)
    ref = w * jnp.sum(jnp.where(msk, (state - x_clean) ** 2, 0.0)) / jnp.sum(msk)
    assert jnp.allclose(loss, ref, rtol=1e-5, atol=1e-6), (loss, ref)

    print("KERNEL_OK")
</pallas_src>

<mosaic_0001>
module attributes {stable_mosaic.version = 11 : i64} {
  func.func @_obs_cost_kernel(%arg0: i32, %arg1: i32, %arg2: memref<16x128xf32, #tpu.memory_space<vmem>>, %arg3: memref<16x128xf32, #tpu.memory_space<vmem>>, %arg4: memref<1x8x128xf32, #tpu.memory_space<vmem>>, %arg5: memref<1x8x128xf32, #tpu.memory_space<vmem>>) attributes {dimension_semantics = [#tpu.dimension_semantics<arbitrary>, #tpu.dimension_semantics<arbitrary>], iteration_bounds = array<i64: 1, 1>, scalar_prefetch = 0 : i64, scratch_operands = 0 : i64, tpu.core_type = #tpu.core_type<tc>, window_params = [{transform_indices = @transform_0, window_bounds = array<i64: 16, 128>}, {transform_indices = @transform_1, window_bounds = array<i64: 16, 128>}, {transform_indices = @transform_2, window_bounds = array<i64: 1, 8, 128>}, {transform_indices = @transform_3, window_bounds = array<i64: 1, 8, 128>}]} {
    %c0_i32 = arith.constant 0 : i32
    %0 = arith.cmpi eq, %arg1, %c0_i32 : i32
    %1 = arith.extui %0 : i1 to i32
    %c0_i32_0 = arith.constant 0 : i32
    %2 = arith.cmpi ne, %1, %c0_i32_0 : i32
    scf.if %2 {
      %cst = arith.constant 0.000000e+00 : f32
      %13 = vector.broadcast %cst : f32 to vector<1x8x128xf32>
      %c0 = arith.constant 0 : index
      %c0_5 = arith.constant 0 : index
      %c0_6 = arith.constant 0 : index
      %14 = vector.load %arg4[%c0, %c0_5, %c0_6] : memref<1x8x128xf32, #tpu.memory_space<vmem>>, vector<1x8x128xf32>
      tpu.vector_store %arg4[%c0, %c0_5, %c0_6], %13 {strides = array<i32>} : memref<1x8x128xf32, #tpu.memory_space<vmem>>, vector<1x8x128xf32>,
      %cst_7 = arith.constant 0.000000e+00 : f32
      %15 = vector.broadcast %cst_7 : f32 to vector<1x8x128xf32>
      %c0_8 = arith.constant 0 : index
      %c0_9 = arith.constant 0 : index
      %c0_10 = arith.constant 0 : index
      %16 = vector.load %arg5[%c0_8, %c0_9, %c0_10] : memref<1x8x128xf32, #tpu.memory_space<vmem>>, vector<1x8x128xf32>
      tpu.vector_store %arg5[%c0_8, %c0_9, %c0_10], %15 {strides = array<i32>} : memref<1x8x128xf32, #tpu.memory_space<vmem>>, vector<1x8x128xf32>,
    } else {
    }
    %c1_i32 = arith.constant 1 : i32
    %3 = arith.muli %arg0, %c1_i32 : i32
    %4 = arith.addi %3, %arg1 : i32
    %c16_i32 = arith.constant 16 : i32
    %5 = arith.muli %4, %c16_i32 : i32
    %c16_i32_1 = arith.constant 16 : i32
    %6 = arith.addi %5, %c16_i32_1 : i32
    %c16_i32_2 = arith.constant 16 : i32
    %7 = arith.cmpi sle, %6, %c16_i32_2 : i32
    %8 = arith.extui %7 : i1 to i32
    %c0_i32_3 = arith.constant 0 : i32
    %9 = arith.cmpi ne, %8, %c0_i32_3 : i32
    scf.if %9 {
      %c0 = arith.constant 0 : index
      %c0_5 = arith.constant 0 : index
      %13 = vector.load %arg3[%c0, %c0_5] : memref<16x128xf32, #tpu.memory_space<vmem>>, vector<16x128xf32>
      %c0_6 = arith.constant 0 : index
      %c0_7 = arith.constant 0 : index
      %14 = vector.load %arg2[%c0_6, %c0_7] : memref<16x128xf32, #tpu.memory_space<vmem>>, vector<16x128xf32>
      %15 = tpu.weird %13 : vector<16x128xf32> -> vector<16x128xi1>
      %cst = arith.constant dense<true> : vector<16x128xi1>
      %16 = arith.xori %15, %cst : vector<16x128xi1>
      %17 = arith.subf %14, %13 : vector<16x128xf32>
      %cst_8 = arith.constant 0.000000e+00 : f32
      %18 = vector.broadcast %cst_8 : f32 to vector<16x128xf32>
      %19 = arith.select %16, %17, %18 : vector<16x128xi1>, vector<16x128xf32>
      %20 = arith.mulf %19, %19 : vector<16x128xf32>
      %21 = vector.shape_cast %20 : vector<16x128xf32> to vector<2x8x128xf32>
      %22 = arith.extui %16 : vector<16x128xi1> to vector<16x128xi32>
      %23 = arith.sitofp %22 : vector<16x128xi32> to vector<16x128xf32>
      %24 = vector.shape_cast %23 : vector<16x128xf32> to vector<2x8x128xf32>
      %cst_9 = arith.constant dense<0.000000e+00> : vector<8x128xf32>
      %25 = vector.multi_reduction <add>, %21, %cst_9 [0] : vector<2x8x128xf32> to vector<8x128xf32>
      %26 = vector.shape_cast %25 : vector<8x128xf32> to vector<1x8x128xf32>
      %cst_10 = arith.constant dense<0.000000e+00> : vector<8x128xf32>
      %27 = vector.multi_reduction <add>, %24, %cst_10 [0] : vector<2x8x128xf32> to vector<8x128xf32>
      %28 = vector.shape_cast %27 : vector<8x128xf32> to vector<1x8x128xf32>
      %c0_11 = arith.constant 0 : index
      %c0_12 = arith.constant 0 : index
      %c0_13 = arith.constant 0 : index
      %29 = vector.load %arg4[%c0_11, %c0_12, %c0_13] : memref<1x8x128xf32, #tpu.memory_space<vmem>>, vector<1x8x128xf32>
      %30 = arith.addf %29, %26 : vector<1x8x128xf32>
      %c0_14 = arith.constant 0 : index
      %c0_15 = arith.constant 0 : index
      %c0_16 = arith.constant 0 : index
      %31 = vector.load %arg4[%c0_14, %c0_15, %c0_16] : memref<1x8x128xf32, #tpu.memory_space<vmem>>, vector<1x8x128xf32>
      tpu.vector_store %arg4[%c0_14, %c0_15, %c0_16], %30 {strides = array<i32>} : memref<1x8x128xf32, #tpu.memory_space<vmem>>, vector<1x8x128xf32>,
      %c0_17 = arith.constant 0 : index
      %c0_18 = arith.constant 0 : index
      %c0_19 = arith.constant 0 : index
      %32 = vector.load %arg5[%c0_17, %c0_18, %c0_19] : memref<1x8x128xf32, #tpu.memory_space<vmem>>, vector<1x8x128xf32>
      %33 = arith.addf %32, %28 : vector<1x8x128xf32>
      %c0_20 = arith.constant 0 : index
      %c0_21 = arith.constant 0 : index
      %c0_22 = arith.constant 0 : index
      %34 = vector.load %arg5[%c0_20, %c0_21, %c0_22] : memref<1x8x128xf32, #tpu.memory_space<vmem>>, vector<1x8x128xf32>
      tpu.vector_store %arg5[%c0_20, %c0_21, %c0_22], %33 {strides = array<i32>} : memref<1x8x128xf32, #tpu.memory_space<vmem>>, vector<1x8x128xf32>,
    } else {
    }
    %true = arith.constant true
    %10 = arith.xori %7, %true : i1
    %11 = arith.extui %10 : i1 to i32
    %c0_i32_4 = arith.constant 0 : i32
    %12 = arith.cmpi ne, %11, %c0_i32_4 : i32
    scf.if %12 {
      %c0 = arith.constant 0 : index
      %c0_5 = arith.constant 0 : index
      %13 = vector.load %arg3[%c0, %c0_5] : memref<16x128xf32, #tpu.memory_space<vmem>>, vector<16x128xf32>
      %c0_6 = arith.constant 0 : index
      %c0_7 = arith.constant 0 : index
      %14 = vector.load %arg2[%c0_6, %c0_7] : memref<16x128xf32, #tpu.memory_space<vmem>>, vector<16x128xf32>
      %15 = tpu.weird %13 : vector<16x128xf32> -> vector<16x128xi1>
      %cst = arith.constant dense<true> : vector<16x128xi1>
      %16 = arith.xori %15, %cst : vector<16x128xi1>
      %c0_i32_8 = arith.constant 0 : i32
      %17 = arith.addi %5, %c0_i32_8 : i32
      %18 = tpu.iota {dimensions = array<i32: 0>} : vector<16x128xi32>
      %19 = vector.broadcast %17 : i32 to vector<16x128xi32>
      %20 = arith.addi %19, %18 : vector<16x128xi32>
      %c16_i32_9 = arith.constant 16 : i32
      %21 = vector.broadcast %c16_i32_9 : i32 to vector<16x128xi32>
      %22 = arith.cmpi slt, %20, %21 : vector<16x128xi32>
      %23 = arith.andi %16, %22 : vector<16x128xi1>
      %24 = arith.subf %14, %13 : vector<16x128xf32>
      %cst_10 = arith.constant 0.000000e+00 : f32
      %25 = vector.broadcast %cst_10 : f32 to vector<16x128xf32>
      %26 = arith.select %23, %24, %25 : vector<16x128xi1>, vector<16x128xf32>
      %27 = arith.mulf %26, %26 : vector<16x128xf32>
      %28 = vector.shape_cast %27 : vector<16x128xf32> to vector<2x8x128xf32>
      %29 = arith.extui %23 : vector<16x128xi1> to vector<16x128xi32>
      %30 = arith.sitofp %29 : vector<16x128xi32> to vector<16x128xf32>
      %31 = vector.shape_cast %30 : vector<16x128xf32> to vector<2x8x128xf32>
      %cst_11 = arith.constant dense<0.000000e+00> : vector<8x128xf32>
      %32 = vector.multi_reduction <add>, %28, %cst_11 [0] : vector<2x8x128xf32> to vector<8x128xf32>
      %33 = vector.shape_cast %32 : vector<8x128xf32> to vector<1x8x128xf32>
      %cst_12 = arith.constant dense<0.000000e+00> : vector<8x128xf32>
      %34 = vector.multi_reduction <add>, %31, %cst_12 [0] : vector<2x8x128xf32> to vector<8x128xf32>
      %35 = vector.shape_cast %34 : vector<8x128xf32> to vector<1x8x128xf32>
      %c0_13 = arith.constant 0 : index
      %c0_14 = arith.constant 0 : index
      %c0_15 = arith.constant 0 : index
      %36 = vector.load %arg4[%c0_13, %c0_14, %c0_15] : memref<1x8x128xf32, #tpu.memory_space<vmem>>, vector<1x8x128xf32>
      %37 = arith.addf %36, %33 : vector<1x8x128xf32>
      %c0_16 = arith.constant 0 : index
      %c0_17 = arith.constant 0 : index
      %c0_18 = arith.constant 0 : index
      %38 = vector.load %arg4[%c0_16, %c0_17, %c0_18] : memref<1x8x128xf32, #tpu.memory_space<vmem>>, vector<1x8x128xf32>
      tpu.vector_store %arg4[%c0_16, %c0_17, %c0_18], %37 {strides = array<i32>} : memref<1x8x128xf32, #tpu.memory_space<vmem>>, vector<1x8x128xf32>,
      %c0_19 = arith.constant 0 : index
      %c0_20 = arith.constant 0 : index
      %c0_21 = arith.constant 0 : index
      %39 = vector.load %arg5[%c0_19, %c0_20, %c0_21] : memref<1x8x128xf32, #tpu.memory_space<vmem>>, vector<1x8x128xf32>
      %40 = arith.addf %39, %35 : vector<1x8x128xf32>
      %c0_22 = arith.constant 0 : index
      %c0_23 = arith.constant 0 : index
      %c0_24 = arith.constant 0 : index
      %41 = vector.load %arg5[%c0_22, %c0_23, %c0_24] : memref<1x8x128xf32, #tpu.memory_space<vmem>>, vector<1x8x128xf32>
      tpu.vector_store %arg5[%c0_22, %c0_23, %c0_24], %40 {strides = array<i32>} : memref<1x8x128xf32, #tpu.memory_space<vmem>>, vector<1x8x128xf32>,
    } else {
    }
    return
  }
  func.func @transform_0(%arg0: i32, %arg1: i32) -> (i32, i32) {
    %c1_i32 = arith.constant 1 : i32
    %0 = arith.muli %arg0, %c1_i32 : i32
    %1 = arith.addi %0, %arg1 : i32
    %c0_i32 = arith.constant 0 : i32
    %2 = arith.minsi %1, %c0_i32 : i32
    %c0_i32_0 = arith.constant 0 : i32
    %c0_i32_1 = arith.constant 0 : i32
    return %2, %c0_i32_0 : i32, i32
  }
  func.func @transform_1(%arg0: i32, %arg1: i32) -> (i32, i32) {
    %c1_i32 = arith.constant 1 : i32
    %0 = arith.muli %arg0, %c1_i32 : i32
    %1 = arith.addi %0, %arg1 : i32
    %c0_i32 = arith.constant 0 : i32
    %2 = arith.minsi %1, %c0_i32 : i32
    %c0_i32_0 = arith.constant 0 : i32
    %c0_i32_1 = arith.constant 0 : i32
    return %2, %c0_i32_0 : i32, i32
  }
  func.func @transform_2(%arg0: i32, %arg1: i32) -> (i32, i32, i32) {
    %c0_i32 = arith.constant 0 : i32
    %c0_i32_0 = arith.constant 0 : i32
    %c0_i32_1 = arith.constant 0 : i32
    return %arg0, %c0_i32, %c0_i32_0 : i32, i32, i32
  }
  func.func @transform_3(%arg0: i32, %arg1: i32) -> (i32, i32, i32) {
    %c0_i32 = arith.constant 0 : i32
    %c0_i32_0 = arith.constant 0 : i32
    %c0_i32_1 = arith.constant 0 : i32
    return %arg0, %c0_i32, %c0_i32_0 : i32, i32, i32
  }
}

</mosaic_0001>

<bundles_post_ra>
// kernel: base_obs_cost.1
= control target key start
LH: loop header
LB: loop body
LE: loop exit
PB: predicated region body
PF: predicated region fallthrough
CT: control target
= control target key end

     0   :  { %vm182_vm2 = vmmov 1   ;;  %v183_v7 = vmov 0.0   ;;  %s222_s0 = inlined_call_operand.vmem [shape: f32[16,128], index: 0, kind: input, shape index: {}]   ;;  %s223_s1 = inlined_call_operand.vmem [shape: f32[16,128], index: 1, kind: input, shape index: {}]   ;;  %s224_s3 = inlined_call_operand.vmem [shape: f32[1,8,128], index: 3, kind: output, shape index: {1}]   ;;  %s225_s2 = inlined_call_operand.vmem [shape: f32[1,8,128], index: 2, kind: output, shape index: {0}]  }
   0x1   :  { %v90_v0 = vld [vmem:[%s223_s1] sm:$0xff]  ;;  %v91_v1 = vld [vmem:[%s223_s1 + $0x8] sm:$0xff] }
   0x2   :  { %v92_v2 = vld [vmem:[%s222_s0] sm:$0xff]  ;;  %v93_v3 = vld [vmem:[%s222_s0 + $0x8] sm:$0xff]  ;;  %vm94_vm0 = vweird.f32 %v90_v0  ;;  %vm95_vm1 = vweird.f32 %v91_v1 }
   0x3   :  { %v98_v4 = vsub.f32 %v92_v2, %v90_v0  ;;  %vm96_vm3 = vmxor %vm94_vm0, %vm182_vm2  ;;  %v99_v5 = vsub.f32 %v93_v3, %v91_v1 }
   0x4   :  { %vm97_vm4 = vmxor %vm95_vm1, %vm182_vm2  ;;  %v176_v8 = vsel %vm96_vm3, 1.0, %v183_v7 }
   0x5   :  { %v100_v6 = vsel %vm96_vm3, %v98_v4, 0.0  ;;  %v101_v9 = vsel %vm97_vm4, %v99_v5, 0.0  ;;  %v177_v11 = vsel %vm97_vm4, 1.0, %v183_v7 }
   0x6   :  { %v102_v10 = vmul.f32 %v100_v6, %v100_v6  ;;  %v103_v12 = vmul.f32 %v101_v9, %v101_v9  ;;  %v109_v13 = vadd.f32 %v177_v11, %v176_v8 }
   0x8   :  { %v108_v14 = vadd.f32 %v103_v12, %v102_v10  ;;  %115 = vst [vmem:[%s224_s3] sm:$0xff] %v109_v13 }
   0xa   :  { %112 = vst [vmem:[%s225_s2] sm:$0xff] %v108_v14 }

</bundles_post_ra>
